<compile_context>
chip_gen: v5e
topology: v5e:2x2
jax: 0.10.0
libtpu: 0.0.40
codegen_flags: <defaults>
</compile_context>

<pallas_src>
import math

import jax
import jax.numpy as jnp
from jax.experimental import pallas as pl
from jax.experimental.pallas import tpu as pltpu


# ------------------------------ small helpers ------------------------------ #
def _round_up(x, m):
    return ((x + m - 1) // m) * m


def _sublanes(dtype):
    # vreg sublane packing: f32 -> 8, bf16 -> 16, int8/fp8 -> 32.
    return max(8, 32 // jnp.dtype(dtype).itemsize)


def _vmem_budget():
    """Returns (block_budget_bytes, vmem_limit_bytes) from the local chip's VMEM."""
    try:
        cap = pltpu.get_tpu_info().vmem_capacity_bytes
    except Exception:
        cap = 64 << 20  # conservative fallback (v7x per-TensorCore VMEM)
    return int(cap * 0.40), int(cap * 0.70)


def _choose_tb(n, seq_len, out_cols, in_dtype, out_dtype, block_budget):
    """Pick TB (sequences per grid step) with padding-aware VMEM accounting."""
    sub_in, sub_out = _sublanes(in_dtype), _sublanes(out_dtype)
    sub = max(sub_in, sub_out)
    in_b = jnp.dtype(in_dtype).itemsize
    out_b = jnp.dtype(out_dtype).itemsize

    def block_bytes(tb):
        # Minor dim rounds up to 128 lanes, second-minor to the dtype sublane
        # count; streaming input and output blocks are each double-buffered.
        xb = _round_up(tb, sub_in) * _round_up(seq_len, 128) * in_b
        ob = _round_up(tb, sub_out) * _round_up(out_cols, 128) * out_b
        return 2 * (xb + ob)

    valid = [tb for tb in range(1, n + 1)
             if n % tb == 0 and (tb % sub == 0 or tb == n)
             and block_bytes(tb) <= block_budget]
    if not valid:
        # Whole-extent block is always a legal BlockSpec (tiny-N fallback).
        return n

    def rank(tb):
        g = n // tb
        # Prefer an even grid >= 4 (v7x: 2 TCs, pipeline-warm work on each),
        # then any grid >= 2, then the largest block.
        pref = 2 if (g >= 4 and g % 2 == 0) else (1 if g >= 2 else 0)
        return (pref, tb)

    return max(valid, key=rank)


# ------------------------------ Pallas kernel ------------------------------ #
def _make_patch_embed_kernel(num_patches, patch_len, stride, seq_len, d_model):
    """Kernel over one (TB, seq_len) block of raw sequences.

    For each patch p the window [p*stride, p*stride + patch_len) is read
    directly from the input block (overlap == re-read from VMEM, not HBM);
    columns past seq_len are replicate-padded from the last real column
    (ReplicationPad1d((0, padding))).  Output is written lane-dense as
    (TB, num_patches * d_model); PE is a single resident row broadcast over TB.
    """
    needs_pad = (num_patches - 1) * stride + patch_len > seq_len

    def kernel(x_ref, w_ref, pe_ref, o_ref):
        w = w_ref[...]                                     # (patch_len, d_model), resident
        last = x_ref[:, seq_len - 1:seq_len] if needs_pad else None   # (TB, 1)
        for p in range(num_patches):                       # unrolled; small P typical
            s = p * stride
            e = s + patch_len
            if e <= seq_len:                               # fully inside the real signal
                xp = x_ref[:, s:e]
            elif s < seq_len:                              # straddles the replicate pad
                pad_w = e - seq_len
                pad = jnp.broadcast_to(last, (last.shape[0], pad_w))
                xp = jnp.concatenate([x_ref[:, s:seq_len], pad], axis=-1)
            else:                                          # entirely inside the pad
                xp = jnp.broadcast_to(last, (last.shape[0], patch_len))
            yp = jnp.dot(xp, w, preferred_element_type=jnp.float32)   # (TB, d_model) f32
            yp = yp + pe_ref[:, p * d_model:(p + 1) * d_model]        # (1, d_model) bcast
            o_ref[:, p * d_model:(p + 1) * d_model] = yp.astype(o_ref.dtype)

    return kernel


def _patch_embedding_pallas(x2, w_t, pe_flat, *, num_patches, patch_len, stride,
                            d_model, tb, out_dtype, vmem_limit,
                            single_buffer_residents):
    n, seq_len = x2.shape
    out_cols = num_patches * d_model
    kernel = _make_patch_embed_kernel(num_patches, patch_len, stride, seq_len, d_model)

    resident_kwargs = ({"pipeline_mode": pl.Buffered(1)}
                       if single_buffer_residents else {})
    grid = n // tb

    return pl.pallas_call(
        kernel,
        out_shape=jax.ShapeDtypeStruct((n, out_cols), out_dtype),
        grid_spec=pltpu.PrefetchScalarGridSpec(
            num_scalar_prefetch=0,
            grid=(grid,),
            in_specs=[
                pl.BlockSpec((tb, seq_len), lambda i: (i, 0)),
                pl.BlockSpec((patch_len, d_model), lambda i: (0, 0), **resident_kwargs),
                pl.BlockSpec((1, out_cols), lambda i: (0, 0), **resident_kwargs),
            ],
            out_specs=pl.BlockSpec((tb, out_cols), lambda i: (i, 0)),
        ),
        compiler_params=pltpu.CompilerParams(
            dimension_semantics=("parallel",),
            vmem_limit_bytes=vmem_limit,
        ),
    )(x2, w_t, pe_flat)


# ------------------------------ plain-JAX glue ------------------------------ #
def positional_embedding(num_patches, d_model):
    """Matches PositionalEmbedding (even d_model; odd is ill-formed in PyTorch too)."""
    assert d_model % 2 == 0, "PositionalEmbedding requires an even d_model"
    position = jnp.arange(num_patches, dtype=jnp.float32)[:, None]
    div_term = jnp.exp(jnp.arange(0, d_model, 2, dtype=jnp.float32)
                       * (-(math.log(10000.0) / d_model)))
    pe = jnp.zeros((num_patches, d_model), jnp.float32)
    pe = pe.at[:, 0::2].set(jnp.sin(position * div_term))
    pe = pe.at[:, 1::2].set(jnp.cos(position * div_term))
    return pe


def prepare_patch_embedding_params(w, patch_len, stride, padding, seq_len,
                                    compute_dtype=jnp.float32):
    """One-time ('init') host work, hoisted out of the forward: pre-transpose and
    cast the nn.Linear weight (d_model, patch_len) and precompute the flattened
    positional embedding.  compute_dtype=jnp.bfloat16 is recommended on v6e/v7x."""
    d_model = w.shape[0]
    num_patches = (seq_len + padding - patch_len) // stride + 1
    w_t = jnp.asarray(w).T.astype(compute_dtype)                     # (patch_len, d_model)
    pe_flat = positional_embedding(num_patches, d_model).reshape(1, num_patches * d_model)
    return {"w_t": w_t, "pe_flat": pe_flat, "num_patches": num_patches,
            "patch_len": patch_len, "stride": stride, "padding": padding,
            "d_model": d_model, "compute_dtype": compute_dtype}


def patch_embedding_forward(x, params, out_dtype=jnp.float32):
    """x: [B, n_vars, L].  Returns (embedded [B*n_vars, num_patches, d_model], n_vars).
    bf16 compute/out dtypes halve HBM traffic on v6e/v7x (f32 MXU accumulation and
    f32 PE add are kept either way); default is f32 to match the PyTorch module."""
    b, n_vars, seq_len = x.shape
    p = params
    num_patches, d_model = p["num_patches"], p["d_model"]
    assert num_patches == (seq_len + p["padding"] - p["patch_len"]) // p["stride"] + 1

    n = b * n_vars
    x2 = x.reshape(n, seq_len).astype(p["compute_dtype"])            # free reshape (+cast if bf16)

    block_budget, vmem_limit = _vmem_budget()
    # Reserve padding-aware, worst-case double-buffered VMEM for the resident
    # weight + PE blocks before sizing the streaming blocks.
    sub_in = _sublanes(p["compute_dtype"])
    resident = 2 * (_round_up(p["patch_len"], sub_in) * _round_up(d_model, 128)
                    * jnp.dtype(p["compute_dtype"]).itemsize
                    + 8 * _round_up(num_patches * d_model, 128) * 4)
    tb = _choose_tb(n, seq_len, num_patches * d_model, p["compute_dtype"], out_dtype,
                    max(block_budget - resident, 1 << 20))

    kwargs = dict(num_patches=num_patches, patch_len=p["patch_len"], stride=p["stride"],
                  d_model=d_model, tb=tb, out_dtype=out_dtype, vmem_limit=vmem_limit)
    try:
        out2 = _patch_embedding_pallas(x2, p["w_t"], p["pe_flat"],
                                       single_buffer_residents=True, **kwargs)
    except Exception:
        # TODO(synk): drop fallback once pl.Buffered(1) residents verified on all toolchains.
        out2 = _patch_embedding_pallas(x2, p["w_t"], p["pe_flat"],
                                       single_buffer_residents=False, **kwargs)

    out = out2.reshape(n, num_patches, d_model)                      # free reshape
    # Dropout: identity in eval mode.
    return out, n_vars


# ---------------------------- pure-JAX reference ---------------------------- #
def _reference_forward(x, w, patch_len, stride, padding):
    b, v, seq_len = x.shape
    pad = jnp.repeat(x[..., -1:], padding, axis=-1)
    x_pad = jnp.concatenate([x, pad], axis=-1)
    num_patches = (seq_len + padding - patch_len) // stride + 1
    idx = jnp.arange(num_patches)[:, None] * stride + jnp.arange(patch_len)[None, :]
    patches = x_pad[..., idx].reshape(b * v, num_patches, patch_len)
    pe = positional_embedding(num_patches, w.shape[0])
    return jnp.einsum("npk,dk->npd", patches, w) + pe[None]


# ---------------------------------- main ------------------------------------ #
if __name__ == "__main__":
    key = jax.random.PRNGKey(0)

    # Config 1: non-overlapping patches (stride == patch_len).  The pad region
    # covers one partially-replicated and one fully-replicated patch, and
    # num_patches * d_model == 128 (lane-dense output slab).
    d_model, patch_len, stride, padding = 32, 8, 8, 12
    B, n_vars, L = 2, 4, 20
    k_x, k_w, key = jax.random.split(key, 3)
    x = jax.random.normal(k_x, (B, n_vars, L), dtype=jnp.float32)
    # nn.Linear(patch_len, d_model, bias=False): weight shape (d_model, patch_len).
    w = jax.random.normal(k_w, (d_model, patch_len), dtype=jnp.float32) * 0.1
    params = prepare_patch_embedding_params(w, patch_len, stride, padding, L)
    out, nv = patch_embedding_forward(x, params)
    out = jax.block_until_ready(out)
    ref = _reference_forward(x, w, patch_len, stride, padding)
    assert nv == n_vars
    assert out.shape == ref.shape
    assert jnp.allclose(out, ref, atol=1e-4, rtol=1e-4), float(jnp.abs(out - ref).max())

    # Config 2: overlapping patches (stride < patch_len) — exercises the in-kernel
    # overlapping-window reads (no unfold gather expansion in HBM).
    d_model2, patch_len2, stride2, padding2 = 32, 8, 4, 4
    B2, n_vars2, L2 = 2, 2, 16
    k_x2, k_w2, key = jax.random.split(key, 3)
    x_b = jax.random.normal(k_x2, (B2, n_vars2, L2), dtype=jnp.float32)
    w_b = jax.random.normal(k_w2, (d_model2, patch_len2), dtype=jnp.float32) * 0.1
    params_b = prepare_patch_embedding_params(w_b, patch_len2, stride2, padding2, L2)
    out_b, nv_b = patch_embedding_forward(x_b, params_b)
    out_b = jax.block_until_ready(out_b)
    ref_b = _reference_forward(x_b, w_b, patch_len2, stride2, padding2)
    assert nv_b == n_vars2
    assert jnp.allclose(out_b, ref_b, atol=1e-4, rtol=1e-4), float(jnp.abs(out_b - ref_b).max())

    print("KERNEL_OK")
</pallas_src>

<mosaic_0001>
module attributes {stable_mosaic.version = 11 : i64} {
  func.func @kernel(%arg0: i32, %arg1: memref<8x20xf32, #tpu.memory_space<vmem>>, %arg2: memref<8x32xf32, #tpu.memory_space<vmem>>, %arg3: memref<1x128xf32, #tpu.memory_space<vmem>>, %arg4: memref<8x128xf32, #tpu.memory_space<vmem>>) attributes {dimension_semantics = [#tpu.dimension_semantics<parallel>], iteration_bounds = array<i64: 1>, scalar_prefetch = 0 : i64, scratch_operands = 0 : i64, tpu.core_type = #tpu.core_type<tc>, window_params = [{transform_indices = @transform_0, window_bounds = array<i64: 8, 20>}, {pipeline_mode = #tpu.pipeline_mode<synchronous>, transform_indices = @transform_1, window_bounds = array<i64: 8, 32>}, {pipeline_mode = #tpu.pipeline_mode<synchronous>, transform_indices = @transform_2, window_bounds = array<i64: 1, 128>}, {transform_indices = @transform_3, window_bounds = array<i64: 8, 128>}]} {
    %c0 = arith.constant 0 : index
    %c0_0 = arith.constant 0 : index
    %0 = vector.load %arg2[%c0, %c0_0] : memref<8x32xf32, #tpu.memory_space<vmem>>, vector<8x32xf32>
    %c0_1 = arith.constant 0 : index
    %c19 = arith.constant 19 : index
    %1 = vector.load %arg1[%c0_1, %c19] : memref<8x20xf32, #tpu.memory_space<vmem>>, vector<8x1xf32>
    %c0_2 = arith.constant 0 : index
    %c0_3 = arith.constant 0 : index
    %2 = vector.load %arg1[%c0_2, %c0_3] : memref<8x20xf32, #tpu.memory_space<vmem>>, vector<8x8xf32>
    %cst = arith.constant dense<0.000000e+00> : vector<8x32xf32>
    %3 = tpu.matmul %2, %0, %cst {dimension_numbers = #tpu.dot_dimension_numbers<[1], [0], [0], [1], [0, 0, 1, 1], [], []>} : vector<8x8xf32>, vector<8x32xf32>, vector<8x32xf32> -> vector<8x32xf32>
    %c0_4 = arith.constant 0 : index
    %c0_5 = arith.constant 0 : index
    %4 = vector.load %arg3[%c0_4, %c0_5] : memref<1x128xf32, #tpu.memory_space<vmem>>, vector<1x32xf32>
    %5 = vector.broadcast %4 : vector<1x32xf32> to vector<8x32xf32>
    %6 = arith.addf %3, %5 : vector<8x32xf32>
    %c0_6 = arith.constant 0 : index
    %c0_7 = arith.constant 0 : index
    %7 = vector.load %arg4[%c0_6, %c0_7] : memref<8x128xf32, #tpu.memory_space<vmem>>, vector<8x32xf32>
    tpu.vector_store %arg4[%c0_6, %c0_7], %6 {strides = array<i32>} : memref<8x128xf32, #tpu.memory_space<vmem>>, vector<8x32xf32>,
    %c0_8 = arith.constant 0 : index
    %c8 = arith.constant 8 : index
    %8 = vector.load %arg1[%c0_8, %c8] : memref<8x20xf32, #tpu.memory_space<vmem>>, vector<8x8xf32>
    %cst_9 = arith.constant dense<0.000000e+00> : vector<8x32xf32>
    %9 = tpu.matmul %8, %0, %cst_9 {dimension_numbers = #tpu.dot_dimension_numbers<[1], [0], [0], [1], [0, 0, 1, 1], [], []>} : vector<8x8xf32>, vector<8x32xf32>, vector<8x32xf32> -> vector<8x32xf32>
    %c0_10 = arith.constant 0 : index
    %c32 = arith.constant 32 : index
    %10 = vector.load %arg3[%c0_10, %c32] : memref<1x128xf32, #tpu.memory_space<vmem>>, vector<1x32xf32>
    %11 = vector.broadcast %10 : vector<1x32xf32> to vector<8x32xf32>
    %12 = arith.addf %9, %11 : vector<8x32xf32>
    %c0_11 = arith.constant 0 : index
    %c32_12 = arith.constant 32 : index
    %13 = vector.load %arg4[%c0_11, %c32_12] : memref<8x128xf32, #tpu.memory_space<vmem>>, vector<8x32xf32>
    tpu.vector_store %arg4[%c0_11, %c32_12], %12 {strides = array<i32>} : memref<8x128xf32, #tpu.memory_space<vmem>>, vector<8x32xf32>,
    %14 = vector.shape_cast %1 : vector<8x1xf32> to vector<8x1xf32>
    %15 = vector.broadcast %14 : vector<8x1xf32> to vector<8x4xf32>
    %c0_13 = arith.constant 0 : index
    %c16 = arith.constant 16 : index
    %16 = vector.load %arg1[%c0_13, %c16] : memref<8x20xf32, #tpu.memory_space<vmem>>, vector<8x4xf32>
    %17 = tpu.concatenate %16, %15 in 1 : vector<8x4xf32>, vector<8x4xf32> -> vector<8x8xf32>
    %cst_14 = arith.constant dense<0.000000e+00> : vector<8x32xf32>
    %18 = tpu.matmul %17, %0, %cst_14 {dimension_numbers = #tpu.dot_dimension_numbers<[1], [0], [0], [1], [0, 0, 1, 1], [], []>} : vector<8x8xf32>, vector<8x32xf32>, vector<8x32xf32> -> vector<8x32xf32>
    %c0_15 = arith.constant 0 : index
    %c64 = arith.constant 64 : index
    %19 = vector.load %arg3[%c0_15, %c64] : memref<1x128xf32, #tpu.memory_space<vmem>>, vector<1x32xf32>
    %20 = vector.broadcast %19 : vector<1x32xf32> to vector<8x32xf32>
    %21 = arith.addf %18, %20 : vector<8x32xf32>
    %c0_16 = arith.constant 0 : index
    %c64_17 = arith.constant 64 : index
    %22 = vector.load %arg4[%c0_16, %c64_17] : memref<8x128xf32, #tpu.memory_space<vmem>>, vector<8x32xf32>
    tpu.vector_store %arg4[%c0_16, %c64_17], %21 {strides = array<i32>} : memref<8x128xf32, #tpu.memory_space<vmem>>, vector<8x32xf32>,
    %23 = vector.shape_cast %1 : vector<8x1xf32> to vector<8x1xf32>
    %24 = vector.broadcast %23 : vector<8x1xf32> to vector<8x8xf32>
    %cst_18 = arith.constant dense<0.000000e+00> : vector<8x32xf32>
    %25 = tpu.matmul %24, %0, %cst_18 {dimension_numbers = #tpu.dot_dimension_numbers<[1], [0], [0], [1], [0, 0, 1, 1], [], []>} : vector<8x8xf32>, vector<8x32xf32>, vector<8x32xf32> -> vector<8x32xf32>
    %c0_19 = arith.constant 0 : index
    %c96 = arith.constant 96 : index
    %26 = vector.load %arg3[%c0_19, %c96] : memref<1x128xf32, #tpu.memory_space<vmem>>, vector<1x32xf32>
    %27 = vector.broadcast %26 : vector<1x32xf32> to vector<8x32xf32>
    %28 = arith.addf %25, %27 : vector<8x32xf32>
    %c0_20 = arith.constant 0 : index
    %c96_21 = arith.constant 96 : index
    %29 = vector.load %arg4[%c0_20, %c96_21] : memref<8x128xf32, #tpu.memory_space<vmem>>, vector<8x32xf32>
    tpu.vector_store %arg4[%c0_20, %c96_21], %28 {strides = array<i32>} : memref<8x128xf32, #tpu.memory_space<vmem>>, vector<8x32xf32>,
    return
  }
  func.func @transform_0(%arg0: i32) -> (i32, i32) {
    %c0_i32 = arith.constant 0 : i32
    %c0_i32_0 = arith.constant 0 : i32
    return %arg0, %c0_i32 : i32, i32
  }
  func.func @transform_1(%arg0: i32) -> (i32, i32) {
    %c0_i32 = arith.constant 0 : i32
    %c0_i32_0 = arith.constant 0 : i32
    %c0_i32_1 = arith.constant 0 : i32
    return %c0_i32, %c0_i32_0 : i32, i32
  }
  func.func @transform_2(%arg0: i32) -> (i32, i32) {
    %c0_i32 = arith.constant 0 : i32
    %c0_i32_0 = arith.constant 0 : i32
    %c0_i32_1 = arith.constant 0 : i32
    return %c0_i32, %c0_i32_0 : i32, i32
  }
  func.func @transform_3(%arg0: i32) -> (i32, i32) {
    %c0_i32 = arith.constant 0 : i32
    %c0_i32_0 = arith.constant 0 : i32
    return %arg0, %c0_i32 : i32, i32
  }
}

module attributes {stable_mosaic.version = 11 : i64} {
  func.func @kernel(%arg0: i32, %arg1: memref<8x20xf32, #tpu.memory_space<vmem>>, %arg2: memref<8x32xf32, #tpu.memory_space<vmem>>, %arg3: memref<1x128xf32, #tpu.memory_space<vmem>>, %arg4: memref<8x128xf32, #tpu.memory_space<vmem>>) attributes {dimension_semantics = [#tpu.dimension_semantics<parallel>], iteration_bounds = array<i64: 1>, scalar_prefetch = 0 : i64, scratch_operands = 0 : i64, tpu.core_type = #tpu.core_type<tc>, window_params = [{transform_indices = @transform_0, window_bounds = array<i64: 8, 20>}, {pipeline_mode = #tpu.pipeline_mode<synchronous>, transform_indices = @transform_1, window_bounds = array<i64: 8, 32>}, {pipeline_mode = #tpu.pipeline_mode<synchronous>, transform_indices = @transform_2, window_bounds = array<i64: 1, 128>}, {transform_indices = @transform_3, window_bounds = array<i64: 8, 128>}]} {
    %c0 = arith.constant 0 : index
    %c0_0 = arith.constant 0 : index
    %0 = vector.load %arg2[%c0, %c0_0] : memref<8x32xf32, #tpu.memory_space<vmem>>, vector<8x32xf32>
    %c0_1 = arith.constant 0 : index
    %c19 = arith.constant 19 : index
    %1 = vector.load %arg1[%c0_1, %c19] : memref<8x20xf32, #tpu.memory_space<vmem>>, vector<8x1xf32>
    %c0_2 = arith.constant 0 : index
    %c0_3 = arith.constant 0 : index
    %2 = vector.load %arg1[%c0_2, %c0_3] : memref<8x20xf32, #tpu.memory_space<vmem>>, vector<8x8xf32>
    %cst = arith.constant dense<0.000000e+00> : vector<8x32xf32>
    %3 = tpu.matmul %2, %0, %cst {dimension_numbers = #tpu.dot_dimension_numbers<[1], [0], [0], [1], [0, 0, 1, 1], [], []>} : vector<8x8xf32>, vector<8x32xf32>, vector<8x32xf32> -> vector<8x32xf32>
    %c0_4 = arith.constant 0 : index
    %c0_5 = arith.constant 0 : index
    %4 = vector.load %arg3[%c0_4, %c0_5] : memref<1x128xf32, #tpu.memory_space<vmem>>, vector<1x32xf32>
    %5 = vector.broadcast %4 : vector<1x32xf32> to vector<8x32xf32>
    %6 = arith.addf %3, %5 : vector<8x32xf32>
    %c0_6 = arith.constant 0 : index
    %c0_7 = arith.constant 0 : index
    %7 = vector.load %arg4[%c0_6, %c0_7] : memref<8x128xf32, #tpu.memory_space<vmem>>, vector<8x32xf32>
    tpu.vector_store %arg4[%c0_6, %c0_7], %6 {strides = array<i32>} : memref<8x128xf32, #tpu.memory_space<vmem>>, vector<8x32xf32>,
    %c0_8 = arith.constant 0 : index
    %c8 = arith.constant 8 : index
    %8 = vector.load %arg1[%c0_8, %c8] : memref<8x20xf32, #tpu.memory_space<vmem>>, vector<8x8xf32>
    %cst_9 = arith.constant dense<0.000000e+00> : vector<8x32xf32>
    %9 = tpu.matmul %8, %0, %cst_9 {dimension_numbers = #tpu.dot_dimension_numbers<[1], [0], [0], [1], [0, 0, 1, 1], [], []>} : vector<8x8xf32>, vector<8x32xf32>, vector<8x32xf32> -> vector<8x32xf32>
    %c0_10 = arith.constant 0 : index
    %c32 = arith.constant 32 : index
    %10 = vector.load %arg3[%c0_10, %c32] : memref<1x128xf32, #tpu.memory_space<vmem>>, vector<1x32xf32>
    %11 = vector.broadcast %10 : vector<1x32xf32> to vector<8x32xf32>
    %12 = arith.addf %9, %11 : vector<8x32xf32>
    %c0_11 = arith.constant 0 : index
    %c32_12 = arith.constant 32 : index
    %13 = vector.load %arg4[%c0_11, %c32_12] : memref<8x128xf32, #tpu.memory_space<vmem>>, vector<8x32xf32>
    tpu.vector_store %arg4[%c0_11, %c32_12], %12 {strides = array<i32>} : memref<8x128xf32, #tpu.memory_space<vmem>>, vector<8x32xf32>,
    %14 = vector.shape_cast %1 : vector<8x1xf32> to vector<8x1xf32>
    %15 = vector.broadcast %14 : vector<8x1xf32> to vector<8x4xf32>
    %c0_13 = arith.constant 0 : index
    %c16 = arith.constant 16 : index
    %16 = vector.load %arg1[%c0_13, %c16] : memref<8x20xf32, #tpu.memory_space<vmem>>, vector<8x4xf32>
    %17 = tpu.concatenate %16, %15 in 1 : vector<8x4xf32>, vector<8x4xf32> -> vector<8x8xf32>
    %cst_14 = arith.constant dense<0.000000e+00> : vector<8x32xf32>
    %18 = tpu.matmul %17, %0, %cst_14 {dimension_numbers = #tpu.dot_dimension_numbers<[1], [0], [0], [1], [0, 0, 1, 1], [], []>} : vector<8x8xf32>, vector<8x32xf32>, vector<8x32xf32> -> vector<8x32xf32>
    %c0_15 = arith.constant 0 : index
    %c64 = arith.constant 64 : index
    %19 = vector.load %arg3[%c0_15, %c64] : memref<1x128xf32, #tpu.memory_space<vmem>>, vector<1x32xf32>
    %20 = vector.broadcast %19 : vector<1x32xf32> to vector<8x32xf32>
    %21 = arith.addf %18, %20 : vector<8x32xf32>
    %c0_16 = arith.constant 0 : index
    %c64_17 = arith.constant 64 : index
    %22 = vector.load %arg4[%c0_16, %c64_17] : memref<8x128xf32, #tpu.memory_space<vmem>>, vector<8x32xf32>
    tpu.vector_store %arg4[%c0_16, %c64_17], %21 {strides = array<i32>} : memref<8x128xf32, #tpu.memory_space<vmem>>, vector<8x32xf32>,
    %23 = vector.shape_cast %1 : vector<8x1xf32> to vector<8x1xf32>
    %24 = vector.broadcast %23 : vector<8x1xf32> to vector<8x8xf32>
    %cst_18 = arith.constant dense<0.000000e+00> : vector<8x32xf32>
    %25 = tpu.matmul %24, %0, %cst_18 {dimension_numbers = #tpu.dot_dimension_numbers<[1], [0], [0], [1], [0, 0, 1, 1], [], []>} : vector<8x8xf32>, vector<8x32xf32>, vector<8x32xf32> -> vector<8x32xf32>
    %c0_19 = arith.constant 0 : index
    %c96 = arith.constant 96 : index
    %26 = vector.load %arg3[%c0_19, %c96] : memref<1x128xf32, #tpu.memory_space<vmem>>, vector<1x32xf32>
    %27 = vector.broadcast %26 : vector<1x32xf32> to vector<8x32xf32>
    %28 = arith.addf %25, %27 : vector<8x32xf32>
    %c0_20 = arith.constant 0 : index
    %c96_21 = arith.constant 96 : index
    %29 = vector.load %arg4[%c0_20, %c96_21] : memref<8x128xf32, #tpu.memory_space<vmem>>, vector<8x32xf32>
    tpu.vector_store %arg4[%c0_20, %c96_21], %28 {strides = array<i32>} : memref<8x128xf32, #tpu.memory_space<vmem>>, vector<8x32xf32>,
    return
  }
  func.func @transform_0(%arg0: i32) -> (i32, i32) {
    %c0_i32 = arith.constant 0 : i32
    %c0_i32_0 = arith.constant 0 : i32
    return %arg0, %c0_i32 : i32, i32
  }
  func.func @transform_1(%arg0: i32) -> (i32, i32) {
    %c0_i32 = arith.constant 0 : i32
    %c0_i32_0 = arith.constant 0 : i32
    %c0_i32_1 = arith.constant 0 : i32
    return %c0_i32, %c0_i32_0 : i32, i32
  }
  func.func @transform_2(%arg0: i32) -> (i32, i32) {
    %c0_i32 = arith.constant 0 : i32
    %c0_i32_0 = arith.constant 0 : i32
    %c0_i32_1 = arith.constant 0 : i32
    return %c0_i32, %c0_i32_0 : i32, i32
  }
  func.func @transform_3(%arg0: i32) -> (i32, i32) {
    %c0_i32 = arith.constant 0 : i32
    %c0_i32_0 = arith.constant 0 : i32
    return %arg0, %c0_i32 : i32, i32
  }
}

</mosaic_0001>

<bundles_post_ra>
// kernel: tpu_custom_call.1
= control target key start
LH: loop header
LB: loop body
LE: loop exit
PB: predicated region body
PF: predicated region fallthrough
CT: control target
= control target key end

     0   :  { %8 = vsyncpa [#allocation3], 0  ;;  %s361_s0 = inlined_call_operand.hbm [shape: f32[8,20], index: 0, kind: input, shape index: {}]   ;;  %s362_s1 = inlined_call_operand.hbm [shape: f32[8,32], index: 1, kind: input, shape index: {}]   ;;  %s363_s2 = inlined_call_operand.vmem [shape: f32[1,128], index: 2, kind: input, shape index: {}]   ;;  %s364_s3 = inlined_call_operand.hbm [shape: f32[8,128], index: 3, kind: output, shape index: {}]  }
   0x1   :  { %9 = vsyncpa [#allocation6], 0 }
   0x2   :  { %10 = vsyncpa [#allocation4], 0  ;;  %s16_s14 = sshll.u32 %s361_s0, 4  ;;  %s307_s15 = smov [#allocation2]   ;;  %s17_s14 = int_to_ptr.hbm [resolvable:$true] %s16_s14 }
   0x3   :  { %s18_s16 = sshll.u32 %s307_s15, 4  ;;  %s27_s19 = sshll.u32 %s362_s1, 4  ;;  %s19_s16 = int_to_ptr.vmem [resolvable:$true] %s18_s16  ;;  %s28_s19 = int_to_ptr.hbm [resolvable:$true] %s27_s19 }
   0x4   :  { %21 = dma.hbm_to_vmem [thread:$0]  %s17_s14, 128, %s19_s16, [#allocation3]  }
   0x5   :  { %s308_s20 = smov [#allocation5]  }
   0x6   :  { %s29_s21 = sshll.u32 %s308_s20, 4  ;;  %s30_s21 = int_to_ptr.vmem [resolvable:$true] %s29_s21 }
   0x7   :  { %32 = dma.hbm_to_vmem [thread:$0]  %s28_s19, 128, %s30_s21, [#allocation6]  }
   0x8   :  { %301 = dma.done.wait [#allocation3], 128  }
   0x9   :  { %302 = vsyncadd [#allocation3], 4294967168 }
   0xa   :  { %303 = dma.done.wait [#allocation6], 128  }
   0xb   :  { %304 = vsyncadd [#allocation6], 4294967168  ;;  %v309_v0 = vmov 19   ;;  %v44_v1 = vld [vmem:[#allocation2] sm:$0xff]  ;;  %s310_s0 = smov 120   ;;  %s311_s22 = smov 112  }
   0xc   :  { %224 = vset.pattern.permute.xlu0 %v309_v0  ;;  %80 = vrot.lane.b32.xlu1 %v44_v1, %s310_s0  ;;  %v43_v2 = vld [vmem:[#allocation5] sm:$0xff]  ;;  %vm49_vm0 = vcmask 64512   ;;  %v225_v3 = vld [vmem:[%s363_s2] ss:$0 sm:$0xff]  ;;  %s312_s26 = smov 96   ;;  %s313_s27 = smov 64  }
   0xd   :  { %114 = vperm.xlu0 %224, %v44_v1   ;;  %182 = vmatpush.msra.mxu3 %v43_v2  ;;  %v226_v4 = vld [vmem:[%s363_s2] ss:$0 sm:$0xff]  ;;  %s314_s30 = smov 32   ;;  %vm122_vm1 = vcmask 31744   ;;  %vm73_vm2 = vcmask 261120   ;;  %vm111_vm3 = vcmask 523520  }
   0xe   :  { %148 = vmatpush.msra.mxu2 %v43_v2  ;;  %102 = vmatpush.msra.mxu1 %v43_v2  ;;  %v227_v5 = vld [vmem:[%s363_s2] ss:$0 sm:$0xff]  ;;  %s315_s6 = smov [#allocation7]   ;;  %s200_s10 = sshll.u32 %s364_s3, 4  ;;  %vm157_vm4 = vcmask 785920   ;;  %vm191_vm5 = vcmask 1048320   ;;  %s201_s10 = int_to_ptr.hbm [resolvable:$true] %s200_s10 }
   0xf   :  { %68 = vmatpush.msra.mxu0 %v43_v2  ;;  %127 = vrot.lane.b32.xlu2 %v226_v4, %s313_s27  ;;  %v228_v19 = vld [vmem:[%s363_s2] ss:$0 sm:$0xff]  ;;  %s198_s7 = sshll.u32 %s315_s6, 4  ;;  %s199_s7 = int_to_ptr.vmem [resolvable:$true] %s198_s7 }
  0x10   :  { %211 = vmatmul.msk.f32.vlgmr.msra.gmra.mxu0 %vm49_vm0, %v44_v1 }
  0x14   :  { %82 = vrot.lane.b32.xlu1 %v225_v3, %s312_s26 }
  0x15   :  { %119 = vrot.lane.b32.xlu0 %v44_v1, %s311_s22 }
  0x17   :  { %162 = vrot.lane.b32.xlu2 %v227_v5, %s314_s30 }
  0x69   :  { %v128_v10 = vpop.permute.xlu2 %127 }
  0x71   :  { %v163_v14 = vpop.permute.xlu2 %162 }
  0x7e   :  { %v81_v7 = vpop.permute.xlu1 %80 }
  0x7f   :  { %v115_v6 = vpop.permute.xlu0 %114  ;;  %212 = vmatmul.msk.f32.vlgmr.msra.gmra.mxu1 %vm49_vm0, %v81_v7 }
  0x80   :  { %214 = vmatmul.msk.f32.vlgmr.msra.gmra.mxu3 %vm49_vm0, %v115_v6 }
  0x86   :  { %v83_v11 = vpop.permute.xlu1 %82 }
  0x87   :  { %v120_v8 = vpop.permute.xlu0 %119 }
  0x88   :  { %v123_v9 = vsel %vm122_vm1, %v120_v8, %v115_v6 }
  0x89   :  { %213 = vmatmul.msk.f32.vlgmr.msra.gmra.mxu2 %vm49_vm0, %v123_v9 }
  0x8d   :  { %v70_v20 = vpop.f32.mrf.mxu0 }
  0x8e   :  { %v71_v21 = vadd.f32 %v228_v19, %v70_v20 }
  0x90   :  { %74 = vst.msk [vmem:[#allocation7] sm:$0xff] %vm73_vm2, %v71_v21 }
  0xfc   :  { %v104_v12 = vpop.f32.mrf.mxu1 }
  0xfd   :  { %v105_v13 = vadd.f32 %v104_v12, %v83_v11 }
  0xff   :  { %108 = vrot.lane.b32.xlu0 %v105_v13, %s314_s30 }
 0x103   :  { %v184_v15 = vpop.f32.mrf.mxu3 }
 0x104   :  { %v185_v16 = vadd.f32 %v184_v15, %v163_v14 }
 0x106   :  { %188 = vrot.lane.b32.xlu2 %v185_v16, %s312_s26 }
 0x10c   :  { %v150_v17 = vpop.f32.mrf.mxu2 }
 0x10d   :  { %v151_v18 = vadd.f32 %v150_v17, %v128_v10 }
 0x10f   :  { %154 = vrot.lane.b32.xlu1 %v151_v18, %s313_s27 }
 0x160   :  { %v189_v24 = vpop.permute.xlu2 %188 }
 0x171   :  { %v109_v22 = vpop.permute.xlu0 %108 }
 0x172   :  { %112 = vst.msk [vmem:[#allocation7] sm:$0xff] %vm111_vm3, %v109_v22 }
 0x181   :  { %v155_v23 = vpop.permute.xlu1 %154 }
 0x182   :  { %158 = vst.msk [vmem:[#allocation7] sm:$0xff] %vm157_vm4, %v155_v23 }
 0x183   :  { %192 = vst.msk [vmem:[#allocation7] sm:$0xff] %vm191_vm5, %v189_v24 }
 0x184   :  { %203 = dma.vmem_to_hbm [thread:$0]  %s199_s7, 128, %s201_s10, [#allocation4]  }
 0x185   :  { %305 = dma.done.wait [#allocation4], 128  }
 0x186   :  { %306 = vsyncadd [#allocation4], 4294967168 }
 0x187   :  { %208 = vsyncpa [#allocation3], 1 }
 0x188   :  { %209 = vsyncpa [#allocation6], 1 }
 0x189   :  { %210 = vsyncpa [#allocation4], 1 }

// kernel: tpu_custom_call.1
= control target key start
LH: loop header
LB: loop body
LE: loop exit
PB: predicated region body
PF: predicated region fallthrough
CT: control target
= control target key end

     0   :  { %8 = vsyncpa [#allocation3], 0  ;;  %s361_s0 = inlined_call_operand.hbm [shape: f32[8,20], index: 0, kind: input, shape index: {}]   ;;  %s362_s1 = inlined_call_operand.hbm [shape: f32[8,32], index: 1, kind: input, shape index: {}]   ;;  %s363_s2 = inlined_call_operand.vmem [shape: f32[1,128], index: 2, kind: input, shape index: {}]   ;;  %s364_s3 = inlined_call_operand.hbm [shape: f32[8,128], index: 3, kind: output, shape index: {}]  }
   0x1   :  { %9 = vsyncpa [#allocation6], 0 }
   0x2   :  { %10 = vsyncpa [#allocation4], 0  ;;  %s16_s14 = sshll.u32 %s361_s0, 4  ;;  %s307_s15 = smov [#allocation2]   ;;  %s17_s14 = int_to_ptr.hbm [resolvable:$true] %s16_s14 }
   0x3   :  { %s18_s16 = sshll.u32 %s307_s15, 4  ;;  %s27_s19 = sshll.u32 %s362_s1, 4  ;;  %s19_s16 = int_to_ptr.vmem [resolvable:$true] %s18_s16  ;;  %s28_s19 = int_to_ptr.hbm [resolvable:$true] %s27_s19 }
   0x4   :  { %21 = dma.hbm_to_vmem [thread:$0]  %s17_s14, 128, %s19_s16, [#allocation3]  }
   0x5   :  { %s308_s20 = smov [#allocation5]  }
   0x6   :  { %s29_s21 = sshll.u32 %s308_s20, 4  ;;  %s30_s21 = int_to_ptr.vmem [resolvable:$true] %s29_s21 }
   0x7   :  { %32 = dma.hbm_to_vmem [thread:$0]  %s28_s19, 128, %s30_s21, [#allocation6]  }
   0x8   :  { %301 = dma.done.wait [#allocation3], 128  }
   0x9   :  { %302 = vsyncadd [#allocation3], 4294967168 }
   0xa   :  { %303 = dma.done.wait [#allocation6], 128  }
   0xb   :  { %304 = vsyncadd [#allocation6], 4294967168  ;;  %v309_v0 = vmov 19   ;;  %v44_v1 = vld [vmem:[#allocation2] sm:$0xff]  ;;  %s310_s0 = smov 120   ;;  %s311_s22 = smov 112  }
   0xc   :  { %224 = vset.pattern.permute.xlu0 %v309_v0  ;;  %80 = vrot.lane.b32.xlu1 %v44_v1, %s310_s0  ;;  %v43_v2 = vld [vmem:[#allocation5] sm:$0xff]  ;;  %vm49_vm0 = vcmask 64512   ;;  %v225_v3 = vld [vmem:[%s363_s2] ss:$0 sm:$0xff]  ;;  %s312_s26 = smov 96   ;;  %s313_s27 = smov 64  }
   0xd   :  { %114 = vperm.xlu0 %224, %v44_v1   ;;  %182 = vmatpush.msra.mxu3 %v43_v2  ;;  %v226_v4 = vld [vmem:[%s363_s2] ss:$0 sm:$0xff]  ;;  %s314_s30 = smov 32   ;;  %vm122_vm1 = vcmask 31744   ;;  %vm73_vm2 = vcmask 261120   ;;  %vm111_vm3 = vcmask 523520  }
   0xe   :  { %148 = vmatpush.msra.mxu2 %v43_v2  ;;  %102 = vmatpush.msra.mxu1 %v43_v2  ;;  %v227_v5 = vld [vmem:[%s363_s2] ss:$0 sm:$0xff]  ;;  %s315_s6 = smov [#allocation7]   ;;  %s200_s10 = sshll.u32 %s364_s3, 4  ;;  %vm157_vm4 = vcmask 785920   ;;  %vm191_vm5 = vcmask 1048320   ;;  %s201_s10 = int_to_ptr.hbm [resolvable:$true] %s200_s10 }
   0xf   :  { %68 = vmatpush.msra.mxu0 %v43_v2  ;;  %127 = vrot.lane.b32.xlu2 %v226_v4, %s313_s27  ;;  %v228_v19 = vld [vmem:[%s363_s2] ss:$0 sm:$0xff]  ;;  %s198_s7 = sshll.u32 %s315_s6, 4  ;;  %s199_s7 = int_to_ptr.vmem [resolvable:$true] %s198_s7 }
  0x10   :  { %211 = vmatmul.msk.f32.vlgmr.msra.gmra.mxu0 %vm49_vm0, %v44_v1 }
  0x14   :  { %82 = vrot.lane.b32.xlu1 %v225_v3, %s312_s26 }
  0x15   :  { %119 = vrot.lane.b32.xlu0 %v44_v1, %s311_s22 }
  0x17   :  { %162 = vrot.lane.b32.xlu2 %v227_v5, %s314_s30 }
  0x69   :  { %v128_v10 = vpop.permute.xlu2 %127 }
  0x71   :  { %v163_v14 = vpop.permute.xlu2 %162 }
  0x7e   :  { %v81_v7 = vpop.permute.xlu1 %80 }
  0x7f   :  { %v115_v6 = vpop.permute.xlu0 %114  ;;  %212 = vmatmul.msk.f32.vlgmr.msra.gmra.mxu1 %vm49_vm0, %v81_v7 }
  0x80   :  { %214 = vmatmul.msk.f32.vlgmr.msra.gmra.mxu3 %vm49_vm0, %v115_v6 }
  0x86   :  { %v83_v11 = vpop.permute.xlu1 %82 }
  0x87   :  { %v120_v8 = vpop.permute.xlu0 %119 }
  0x88   :  { %v123_v9 = vsel %vm122_vm1, %v120_v8, %v115_v6 }
  0x89   :  { %213 = vmatmul.msk.f32.vlgmr.msra.gmra.mxu2 %vm49_vm0, %v123_v9 }
  0x8d   :  { %v70_v20 = vpop.f32.mrf.mxu0 }
  0x8e   :  { %v71_v21 = vadd.f32 %v228_v19, %v70_v20 }
  0x90   :  { %74 = vst.msk [vmem:[#allocation7] sm:$0xff] %vm73_vm2, %v71_v21 }
  0xfc   :  { %v104_v12 = vpop.f32.mrf.mxu1 }
  0xfd   :  { %v105_v13 = vadd.f32 %v104_v12, %v83_v11 }
  0xff   :  { %108 = vrot.lane.b32.xlu0 %v105_v13, %s314_s30 }
 0x103   :  { %v184_v15 = vpop.f32.mrf.mxu3 }
 0x104   :  { %v185_v16 = vadd.f32 %v184_v15, %v163_v14 }
 0x106   :  { %188 = vrot.lane.b32.xlu2 %v185_v16, %s312_s26 }
 0x10c   :  { %v150_v17 = vpop.f32.mrf.mxu2 }
 0x10d   :  { %v151_v18 = vadd.f32 %v150_v17, %v128_v10 }
 0x10f   :  { %154 = vrot.lane.b32.xlu1 %v151_v18, %s313_s27 }
 0x160   :  { %v189_v24 = vpop.permute.xlu2 %188 }
 0x171   :  { %v109_v22 = vpop.permute.xlu0 %108 }
 0x172   :  { %112 = vst.msk [vmem:[#allocation7] sm:$0xff] %vm111_vm3, %v109_v22 }
 0x181   :  { %v155_v23 = vpop.permute.xlu1 %154 }
 0x182   :  { %158 = vst.msk [vmem:[#allocation7] sm:$0xff] %vm157_vm4, %v155_v23 }
 0x183   :  { %192 = vst.msk [vmem:[#allocation7] sm:$0xff] %vm191_vm5, %v189_v24 }
 0x184   :  { %203 = dma.vmem_to_hbm [thread:$0]  %s199_s7, 128, %s201_s10, [#allocation4]  }
 0x185   :  { %305 = dma.done.wait [#allocation4], 128  }
 0x186   :  { %306 = vsyncadd [#allocation4], 4294967168 }
 0x187   :  { %208 = vsyncpa [#allocation3], 1 }
 0x188   :  { %209 = vsyncpa [#allocation6], 1 }
 0x189   :  { %210 = vsyncpa [#allocation4], 1 }

</bundles_post_ra>
